<compile_context>
chip_gen: v7x
topology: tpu7x:2x2x1
jax: 0.10.0
libtpu: 0.0.40
codegen_flags: <defaults>
</compile_context>

<pallas_src>
import numpy as np
import jax
import jax.numpy as jnp
from jax.experimental import pallas as pl
from jax.experimental.pallas import tpu as pltpu


def _flat_2d_view(total: int):
    """Pick a lane-dense (rows, cols) factorization of `total` elements."""
    for c in (1024, 512, 256, 128):
        if total % c == 0:
            return total // c, c
    # Awkward sizes: single contiguous row (still a single contiguous DMA).
    return 1, total


def reshape_forward(x, shape):
    """Pallas implementation of Reshape.forward: x.reshape([-1] + list(shape))."""
    shape = [int(s) for s in shape]
    total = int(np.prod(x.shape)) if x.ndim > 0 else 1
    tail = int(np.prod(shape)) if len(shape) > 0 else 1
    assert tail > 0 and total % tail == 0, "cannot infer leading -1 dimension"
    lead = total // tail
    out_shape = tuple([lead] + shape)

    rows, cols = _flat_2d_view(total)

    # Largest chunk count <= 8 that evenly divides `rows`: every DMA descriptor
    # is identical, contiguous, and statically sized.
    n_chunks = 1
    for c in range(min(rows, 8), 0, -1):
        if rows % c == 0:
            n_chunks = c
            break
    chunk_rows = rows // n_chunks

    def kernel(x_hbm, o_hbm, sem):
        i = pl.program_id(0)
        r0 = pl.multiple_of(i * chunk_rows, chunk_rows)
        cp = pltpu.make_async_copy(
            x_hbm.at[pl.ds(r0, chunk_rows), :],
            o_hbm.at[pl.ds(r0, chunk_rows), :],
            sem.at[0],
        )
        cp.start()
        cp.wait()

    # Free (metadata-only) reshape to the flat lane-dense view.
    x_flat = x.reshape(rows, cols)

    out_flat = pl.pallas_call(
        kernel,
        out_shape=jax.ShapeDtypeStruct((rows, cols), x.dtype),
        grid=(n_chunks,),
        in_specs=[pl.BlockSpec(memory_space=pl.ANY)],
        out_specs=pl.BlockSpec(memory_space=pl.ANY),
        scratch_shapes=[pltpu.SemaphoreType.DMA((1,))],
        compiler_params=pltpu.CompilerParams(
            dimension_semantics=("parallel",),
        ),
    )(x_flat)

    # Free (metadata-only) reshape to the module's target shape.
    return out_flat.reshape(out_shape)


if __name__ == "__main__":
    key = jax.random.PRNGKey(0)
    k1, k2 = jax.random.split(key)

    # Case 1: NCHW-style input, Reshape([8, 128]) -> (-1, 8, 128).
    x = jax.random.normal(k1, (2, 4, 16, 16), dtype=jnp.float32)
    target_shape = [8, 128]
    out = jax.block_until_ready(reshape_forward(x, target_shape))
    ref = jnp.reshape(x, tuple([-1] + target_shape))
    assert out.shape == ref.shape and out.dtype == ref.dtype
    assert bool(jnp.array_equal(out, ref))

    # Case 2: awkward (non-128-divisible) size exercises the fallback path.
    y = jax.random.normal(k2, (3, 5, 7), dtype=jnp.float32)
    out2 = jax.block_until_ready(reshape_forward(y, [7]))
    ref2 = jnp.reshape(y, (-1, 7))
    assert out2.shape == ref2.shape and out2.dtype == ref2.dtype
    assert bool(jnp.array_equal(out2, ref2))

    print("KERNEL_OK")
</pallas_src>

<mosaic_0001>
module attributes {stable_mosaic.version = 11 : i64} {
  func.func @kernel(%arg0: i32, %arg1: memref<2x1024xf32, #tpu.memory_space<any>>, %arg2: memref<2x1024xf32, #tpu.memory_space<any>>, %arg3: memref<1x!tpu.dma_semaphore, #tpu.memory_space<semaphore_mem>>) attributes {dimension_semantics = [#tpu.dimension_semantics<parallel>], iteration_bounds = array<i64: 2>, scalar_prefetch = 0 : i64, scratch_operands = 1 : i64, tpu.core_type = #tpu.core_type<tc>, window_params = [{}, {}]} {
    %c1_i32 = arith.constant 1 : i32
    %0 = arith.muli %arg0, %c1_i32 : i32
    %1 = tpu.assume_multiple %0, 1 : i32
    %c0_i32 = arith.constant 0 : i32
    %c0_i32_0 = arith.constant 0 : i32
    %2 = tpu.memref_slice %arg1[%1, %c0_i32_0] : memref<2x1024xf32, #tpu.memory_space<any>> -> memref<1x1024xf32, #tpu.memory_space<any>>
    %c0_i32_1 = arith.constant 0 : i32
    %3 = tpu.memref_slice %arg2[%1, %c0_i32_1] : memref<2x1024xf32, #tpu.memory_space<any>> -> memref<1x1024xf32, #tpu.memory_space<any>>
    %4 = tpu.memref_slice %arg3[%c0_i32] : memref<1x!tpu.dma_semaphore, #tpu.memory_space<semaphore_mem>> -> memref<1x!tpu.dma_semaphore, #tpu.memory_space<semaphore_mem>>
    %5 = tpu.memref_squeeze %4 : memref<1x!tpu.dma_semaphore, #tpu.memory_space<semaphore_mem>> -> memref<!tpu.dma_semaphore, #tpu.memory_space<semaphore_mem>>
    tpu.enqueue_dma source(%2 : memref<1x1024xf32, #tpu.memory_space<any>>) target(%3 : memref<1x1024xf32, #tpu.memory_space<any>>) target_semaphore(%5 : memref<!tpu.dma_semaphore, #tpu.memory_space<semaphore_mem>>)
    %c0_i32_2 = arith.constant 0 : i32
    %c0_i32_3 = arith.constant 0 : i32
    %6 = tpu.memref_slice %arg1[%1, %c0_i32_3] : memref<2x1024xf32, #tpu.memory_space<any>> -> memref<1x1024xf32, #tpu.memory_space<any>>
    %c0_i32_4 = arith.constant 0 : i32
    %7 = tpu.memref_slice %arg2[%1, %c0_i32_4] : memref<2x1024xf32, #tpu.memory_space<any>> -> memref<1x1024xf32, #tpu.memory_space<any>>
    %8 = tpu.memref_slice %arg3[%c0_i32_2] : memref<1x!tpu.dma_semaphore, #tpu.memory_space<semaphore_mem>> -> memref<1x!tpu.dma_semaphore, #tpu.memory_space<semaphore_mem>>
    %9 = tpu.memref_squeeze %8 : memref<1x!tpu.dma_semaphore, #tpu.memory_space<semaphore_mem>> -> memref<!tpu.dma_semaphore, #tpu.memory_space<semaphore_mem>>
    tpu.wait_dma2 semaphore(%9 : memref<!tpu.dma_semaphore, #tpu.memory_space<semaphore_mem>>) src(%6 : memref<1x1024xf32, #tpu.memory_space<any>>) dst(%7 : memref<1x1024xf32, #tpu.memory_space<any>>)
    return
  }
}

</mosaic_0001>

<bundles_post_ra>
// kernel: tpu_custom_call.1
= control target key start
LH: loop header
LB: loop body
LE: loop exit
PB: predicated region body
PF: predicated region fallthrough
CT: control target
= control target key end

     0   :  { %s85_s6 = smov 0   ;;  %s110_s0 = inlined_call_operand.hbm [shape: f32[2,1024], index: 0, kind: input, shape index: {}]   ;;  %s111_s1 = inlined_call_operand.hbm [shape: f32[2,1024], index: 1, kind: output, shape index: {}]  }
   0x1 LB: > { %s13_s7 = sshrl.u32 %s87_s6, 1  ;;  %s14_s8 = sand.u32 1, %s87_s6   ;;  %s87_s6 = sphi %s85_s6, %s11_s6  }
   0x2   : > { %s62_s9 = sshll.u32 %s13_s7, 4  ;;  %s89_s11 = smov 32  }
   0x3   : > { %s16_s10 = sadd.s32 %s62_s9, %s14_s8  ;;  %33 = sst [smem:[#allocation4]] %s89_s11 }
   0x4   : > { %s63_s12 = sshll.u32 %s16_s10, 4  ;;  %35 = sst [smem:[#allocation4 + $0x1]] %s89_s11 }
   0x5   : > { %s18_s15 = scalar_lea.hbm %s110_s0, %s63_s12  ;;  %s20_s18 = scalar_lea.hbm %s111_s1, %s63_s12 }
   0x6   : > { %s90_s19 = smov 1   ;;  %s91_s20 = smov [#allocation2]  }
   0x7   : > { %37 = sst [smem:[#allocation4 + $0x2]] %s90_s19  ;;  %s92_s21 = smov [#allocation3]  }
   0x8   : > { %s93_s22 = smov 0  }
   0x9   : > { %39 = dma.general %s18_s15, 128, %s20_s18, %s91_s20, %s92_s21, [#allocation4], %s93_s22, 0  }
   0xa   : > { %83 = dma.done.wait [#allocation2], 128 }
   0xb   : > { %84 = vsyncadd [#allocation2], 4294967168  ;;  %s11_s6 = sadd.s32 1, %s87_s6  }
   0xc   : > { %p8_p0 = scmp.ge.s32.totalorder %s11_s6, 2  }
   0xe   :  { %10 = sbr.rel (!%p8_p0) target bundleno = 1 (0x1), region = 23 }
  0x15   :  { %43 = vsyncmov [#allocation2] }
  0x18   :  { %s44_s23 = vpop.sfrf %43 }
  0x19   :  { %p65_p1 = scmp.ne.s32.totalorder %s44_s23, 0 }
  0x1b   :  { %48 = shalt.err (%p65_p1)  }

</bundles_post_ra>
